<compile_context>
chip_gen: v7x
topology: tpu7x:2x2x1
jax: 0.10.0
libtpu: 0.0.40
codegen_flags: <defaults>
</compile_context>

<pallas_src>
import jax
import jax.numpy as jnp
from jax.experimental import pallas as pl
from jax.experimental.pallas import tpu as pltpu

HIDDEN = 64
LANE = 128       # TPU lane width: the batch axis lives on lanes
SUBLANE = 8      # f32 sublane granularity: action dim padded to this
TB_MAX = 1024    # max batch-lanes per grid step (amortizes per-step overhead)


def _round_up(n, m):
    return (n + m - 1) // m * m


def _choose_tiling(batch):
    """Pick (TB, Bp): TB a multiple of 128 lanes; even #tiles when >1 tile (v7x)."""
    bp = _round_up(max(batch, 1), LANE)
    if bp <= LANE:
        return bp, bp                      # single 128-wide tile, grid = 1
    n = -(-bp // TB_MAX)                   # ceil(bp / TB_MAX)
    n = max(2, n + (n % 2))                # even tile count -> both TCs busy on v7x
    tb = _round_up(-(-bp // n), LANE)
    bp = _round_up(bp, tb)
    return tb, bp


def dqn_kernel(x_ref, w1_ref, b1_ref, w2_ref, b2_ref, w3_ref, b3_ref, o_ref):
    # x_ref: (S, TB) f32, batch on lanes.  Weights (out, in) bf16, biases (out, 1) f32.
    x = x_ref[...].astype(jnp.bfloat16)                              # cast in-kernel (VPU)
    h1 = jnp.dot(w1_ref[...], x,
                 preferred_element_type=jnp.float32) + b1_ref[...]   # (64, TB) f32
    h1 = jnp.maximum(h1, 0.0)                                        # ReLU in f32
    h2 = jnp.dot(w2_ref[...], h1.astype(jnp.bfloat16),
                 preferred_element_type=jnp.float32) + b2_ref[...]   # (64, TB) f32
    h2 = jnp.maximum(h2, 0.0)
    out = jnp.dot(w3_ref[...], h2.astype(jnp.bfloat16),
                  preferred_element_type=jnp.float32) + b3_ref[...]  # (Ap, TB) f32
    o_ref[...] = out.astype(o_ref.dtype)                             # lane-dense store


def dqn_forward(x, params):
    """x: (B, state_size) f32.  Returns (B, action_size) f32."""
    w1, b1, w2, b2, w3, b3 = (params[k] for k in ("w1", "b1", "w2", "b2", "w3", "b3"))
    B, S = x.shape
    Ap = w3.shape[0]                       # action dim padded to 8 sublanes
    A = params["action_size"]

    TB, Bp = _choose_tiling(B)

    # Feature-major input: (S, Bp) f32, zero-padded only along the batch/lane axis.
    xt = jnp.zeros((S, Bp), jnp.float32).at[:, :B].set(x.T.astype(jnp.float32))

    out = pl.pallas_call(
        dqn_kernel,
        out_shape=jax.ShapeDtypeStruct((Ap, Bp), jnp.float32),
        grid_spec=pltpu.PrefetchScalarGridSpec(
            num_scalar_prefetch=0,
            grid=(Bp // TB,),
            in_specs=[
                pl.BlockSpec((S, TB), lambda i: (0, i)),      # x: batch-tiled on lanes
                pl.BlockSpec(w1.shape, lambda i: (0, 0)),     # weights/biases VMEM-resident
                pl.BlockSpec(b1.shape, lambda i: (0, 0)),
                pl.BlockSpec(w2.shape, lambda i: (0, 0)),
                pl.BlockSpec(b2.shape, lambda i: (0, 0)),
                pl.BlockSpec(w3.shape, lambda i: (0, 0)),
                pl.BlockSpec(b3.shape, lambda i: (0, 0)),
            ],
            out_specs=pl.BlockSpec((Ap, TB), lambda i: (0, i)),
        ),
        compiler_params=pltpu.CompilerParams(
            dimension_semantics=("parallel",)),               # megacore split on v7x
    )(xt, w1, b1, w2, b2, w3, b3)

    return out[:A, :B].T


def init_params(key, state_size, action_size):
    """torch.nn.Linear-style init U(-1/sqrt(fan_in), +1/sqrt(fan_in)).
    Weights stored torch-style (out, in) in bf16; biases as (out, 1) f32 columns.
    Only the final layer's output dim is padded (to 8 sublanes) with exact zeros."""
    def linear(k, fan_in, fan_out):
        kw, kb = jax.random.split(k)
        bound = 1.0 / (fan_in ** 0.5)
        w = jax.random.uniform(kw, (fan_out, fan_in), jnp.float32, -bound, bound)
        b = jax.random.uniform(kb, (fan_out, 1), jnp.float32, -bound, bound)
        return w, b

    k1, k2, k3 = jax.random.split(key, 3)
    w1, b1 = linear(k1, state_size, HIDDEN)
    w2, b2 = linear(k2, HIDDEN, HIDDEN)
    w3, b3 = linear(k3, HIDDEN, action_size)

    Ap = _round_up(action_size, SUBLANE)
    w3p = jnp.zeros((Ap, HIDDEN), jnp.float32).at[:action_size].set(w3)
    b3p = jnp.zeros((Ap, 1), jnp.float32).at[:action_size].set(b3)

    return {
        "w1": w1.astype(jnp.bfloat16),          # (64, S)
        "b1": b1,                                # (64, 1) f32
        "w2": w2.astype(jnp.bfloat16),          # (64, 64)
        "b2": b2,                                # (64, 1) f32
        "w3": w3p.astype(jnp.bfloat16),         # (8, 64), rows >= A are zero
        "b3": b3p,                               # (8, 1) f32, rows >= A are zero
        "state_size": state_size,
        "action_size": action_size,
    }


def dqn_reference(x, params):
    """Dtype-matched reference (bf16 matmul inputs, f32 accumulate/elementwise)."""
    xb = x.T.astype(jnp.bfloat16)
    h1 = jnp.maximum(jnp.dot(params["w1"], xb,
                             preferred_element_type=jnp.float32) + params["b1"], 0.0)
    h2 = jnp.maximum(jnp.dot(params["w2"], h1.astype(jnp.bfloat16),
                             preferred_element_type=jnp.float32) + params["b2"], 0.0)
    out = jnp.dot(params["w3"], h2.astype(jnp.bfloat16),
                  preferred_element_type=jnp.float32) + params["b3"]
    return out[: params["action_size"]].T


if __name__ == "__main__":
    key = jax.random.PRNGKey(0)
    k_x, k_p, k_big = jax.random.split(key, 3)

    batch = 2
    state_size = 8
    action_size = 4

    params = init_params(k_p, state_size, action_size)

    # Small demo batch (padded to a single 128-lane tile inside the wrapper).
    x = jax.random.normal(k_x, (batch, state_size), dtype=jnp.float32)
    out = jax.block_until_ready(dqn_forward(x, params))
    ref = dqn_reference(x, params)
    assert out.shape == (batch, action_size)
    assert jnp.allclose(out, ref, atol=1e-2, rtol=1e-2)

    # Larger (replay-buffer sized) batch: exercises the even 2-tile parallel grid.
    big_batch = 1120
    x_big = jax.random.normal(k_big, (big_batch, state_size), dtype=jnp.float32)
    out_big = jax.block_until_ready(dqn_forward(x_big, params))
    ref_big = dqn_reference(x_big, params)
    assert out_big.shape == (big_batch, action_size)
    assert jnp.allclose(out_big, ref_big, atol=1e-2, rtol=1e-2)

    print("KERNEL_OK")
</pallas_src>

<mosaic_0001>
module attributes {stable_mosaic.version = 11 : i64} {
  func.func @dqn_kernel(%arg0: i32, %arg1: memref<8x128xf32, #tpu.memory_space<vmem>>, %arg2: memref<64x8xbf16, #tpu.memory_space<vmem>>, %arg3: memref<64x1xf32, #tpu.memory_space<vmem>>, %arg4: memref<64x64xbf16, #tpu.memory_space<vmem>>, %arg5: memref<64x1xf32, #tpu.memory_space<vmem>>, %arg6: memref<8x64xbf16, #tpu.memory_space<vmem>>, %arg7: memref<8x1xf32, #tpu.memory_space<vmem>>, %arg8: memref<8x128xf32, #tpu.memory_space<vmem>>) attributes {dimension_semantics = [#tpu.dimension_semantics<parallel>], iteration_bounds = array<i64: 1>, scalar_prefetch = 0 : i64, scratch_operands = 0 : i64, tpu.core_type = #tpu.core_type<tc>, window_params = [{transform_indices = @transform_0, window_bounds = array<i64: 8, 128>}, {pipeline_mode = #tpu.pipeline_mode<synchronous>, transform_indices = @transform_1, window_bounds = array<i64: 64, 8>}, {pipeline_mode = #tpu.pipeline_mode<synchronous>, transform_indices = @transform_2, window_bounds = array<i64: 64, 1>}, {pipeline_mode = #tpu.pipeline_mode<synchronous>, transform_indices = @transform_3, window_bounds = array<i64: 64, 64>}, {pipeline_mode = #tpu.pipeline_mode<synchronous>, transform_indices = @transform_4, window_bounds = array<i64: 64, 1>}, {pipeline_mode = #tpu.pipeline_mode<synchronous>, transform_indices = @transform_5, window_bounds = array<i64: 8, 64>}, {pipeline_mode = #tpu.pipeline_mode<synchronous>, transform_indices = @transform_6, window_bounds = array<i64: 8, 1>}, {transform_indices = @transform_7, window_bounds = array<i64: 8, 128>}]} {
    %c0 = arith.constant 0 : index
    %c0_0 = arith.constant 0 : index
    %0 = vector.load %arg1[%c0, %c0_0] : memref<8x128xf32, #tpu.memory_space<vmem>>, vector<8x128xf32>
    %1 = arith.truncf %0 : vector<8x128xf32> to vector<8x128xbf16>
    %c0_1 = arith.constant 0 : index
    %c0_2 = arith.constant 0 : index
    %2 = vector.load %arg2[%c0_1, %c0_2] : memref<64x8xbf16, #tpu.memory_space<vmem>>, vector<64x8xbf16>
    %cst = arith.constant dense<0.000000e+00> : vector<64x128xf32>
    %3 = tpu.matmul %2, %1, %cst {dimension_numbers = #tpu.dot_dimension_numbers<[1], [0], [0], [1], [0, 0, 1, 1], [], []>} : vector<64x8xbf16>, vector<8x128xbf16>, vector<64x128xf32> -> vector<64x128xf32>
    %c0_3 = arith.constant 0 : index
    %c0_4 = arith.constant 0 : index
    %4 = vector.load %arg3[%c0_3, %c0_4] : memref<64x1xf32, #tpu.memory_space<vmem>>, vector<64x1xf32>
    %5 = vector.broadcast %4 : vector<64x1xf32> to vector<64x128xf32>
    %6 = arith.addf %3, %5 : vector<64x128xf32>
    %cst_5 = arith.constant 0.000000e+00 : f32
    %7 = vector.broadcast %cst_5 : f32 to vector<64x128xf32>
    %8 = arith.maximumf %6, %7 : vector<64x128xf32>
    %c0_6 = arith.constant 0 : index
    %c0_7 = arith.constant 0 : index
    %9 = vector.load %arg4[%c0_6, %c0_7] : memref<64x64xbf16, #tpu.memory_space<vmem>>, vector<64x64xbf16>
    %10 = arith.truncf %8 : vector<64x128xf32> to vector<64x128xbf16>
    %cst_8 = arith.constant dense<0.000000e+00> : vector<64x128xf32>
    %11 = tpu.matmul %9, %10, %cst_8 {dimension_numbers = #tpu.dot_dimension_numbers<[1], [0], [0], [1], [0, 0, 1, 1], [], []>} : vector<64x64xbf16>, vector<64x128xbf16>, vector<64x128xf32> -> vector<64x128xf32>
    %c0_9 = arith.constant 0 : index
    %c0_10 = arith.constant 0 : index
    %12 = vector.load %arg5[%c0_9, %c0_10] : memref<64x1xf32, #tpu.memory_space<vmem>>, vector<64x1xf32>
    %13 = vector.broadcast %12 : vector<64x1xf32> to vector<64x128xf32>
    %14 = arith.addf %11, %13 : vector<64x128xf32>
    %cst_11 = arith.constant 0.000000e+00 : f32
    %15 = vector.broadcast %cst_11 : f32 to vector<64x128xf32>
    %16 = arith.maximumf %14, %15 : vector<64x128xf32>
    %c0_12 = arith.constant 0 : index
    %c0_13 = arith.constant 0 : index
    %17 = vector.load %arg6[%c0_12, %c0_13] : memref<8x64xbf16, #tpu.memory_space<vmem>>, vector<8x64xbf16>
    %18 = arith.truncf %16 : vector<64x128xf32> to vector<64x128xbf16>
    %cst_14 = arith.constant dense<0.000000e+00> : vector<8x128xf32>
    %19 = tpu.matmul %17, %18, %cst_14 {dimension_numbers = #tpu.dot_dimension_numbers<[1], [0], [0], [1], [0, 0, 1, 1], [], []>} : vector<8x64xbf16>, vector<64x128xbf16>, vector<8x128xf32> -> vector<8x128xf32>
    %c0_15 = arith.constant 0 : index
    %c0_16 = arith.constant 0 : index
    %20 = vector.load %arg7[%c0_15, %c0_16] : memref<8x1xf32, #tpu.memory_space<vmem>>, vector<8x1xf32>
    %21 = vector.broadcast %20 : vector<8x1xf32> to vector<8x128xf32>
    %22 = arith.addf %19, %21 : vector<8x128xf32>
    %c0_17 = arith.constant 0 : index
    %c0_18 = arith.constant 0 : index
    %23 = vector.load %arg8[%c0_17, %c0_18] : memref<8x128xf32, #tpu.memory_space<vmem>>, vector<8x128xf32>
    tpu.vector_store %arg8[%c0_17, %c0_18], %22 {strides = array<i32>} : memref<8x128xf32, #tpu.memory_space<vmem>>, vector<8x128xf32>,
    return
  }
  func.func @transform_0(%arg0: i32) -> (i32, i32) {
    %c0_i32 = arith.constant 0 : i32
    %c0_i32_0 = arith.constant 0 : i32
    return %c0_i32, %arg0 : i32, i32
  }
  func.func @transform_1(%arg0: i32) -> (i32, i32) {
    %c0_i32 = arith.constant 0 : i32
    %c0_i32_0 = arith.constant 0 : i32
    %c0_i32_1 = arith.constant 0 : i32
    return %c0_i32, %c0_i32_0 : i32, i32
  }
  func.func @transform_2(%arg0: i32) -> (i32, i32) {
    %c0_i32 = arith.constant 0 : i32
    %c0_i32_0 = arith.constant 0 : i32
    %c0_i32_1 = arith.constant 0 : i32
    return %c0_i32, %c0_i32_0 : i32, i32
  }
  func.func @transform_3(%arg0: i32) -> (i32, i32) {
    %c0_i32 = arith.constant 0 : i32
    %c0_i32_0 = arith.constant 0 : i32
    %c0_i32_1 = arith.constant 0 : i32
    return %c0_i32, %c0_i32_0 : i32, i32
  }
  func.func @transform_4(%arg0: i32) -> (i32, i32) {
    %c0_i32 = arith.constant 0 : i32
    %c0_i32_0 = arith.constant 0 : i32
    %c0_i32_1 = arith.constant 0 : i32
    return %c0_i32, %c0_i32_0 : i32, i32
  }
  func.func @transform_5(%arg0: i32) -> (i32, i32) {
    %c0_i32 = arith.constant 0 : i32
    %c0_i32_0 = arith.constant 0 : i32
    %c0_i32_1 = arith.constant 0 : i32
    return %c0_i32, %c0_i32_0 : i32, i32
  }
  func.func @transform_6(%arg0: i32) -> (i32, i32) {
    %c0_i32 = arith.constant 0 : i32
    %c0_i32_0 = arith.constant 0 : i32
    %c0_i32_1 = arith.constant 0 : i32
    return %c0_i32, %c0_i32_0 : i32, i32
  }
  func.func @transform_7(%arg0: i32) -> (i32, i32) {
    %c0_i32 = arith.constant 0 : i32
    %c0_i32_0 = arith.constant 0 : i32
    return %c0_i32, %arg0 : i32, i32
  }
}

</mosaic_0001>

<bundles_post_ra>
// kernel: tpu_custom_call.1
= control target key start
LH: loop header
LB: loop body
LE: loop exit
PB: predicated region body
PF: predicated region fallthrough
CT: control target
= control target key end

     0   :  { %vm119_vm0 = vcmask 1043456   ;;  %vm106_vm1 = vcmask 64512   ;;  %v543_v6 = vmov 0   ;;  %s689_s0 = inlined_call_operand.vmem [shape: f32[8,128], index: 0, kind: input, shape index: {}]   ;;  %s690_s1 = inlined_call_operand.vmem [shape: bf16[64,8], index: 1, kind: input, shape index: {}]   ;;  %s691_s2 = inlined_call_operand.vmem [shape: f32[64,1], index: 2, kind: input, shape index: {}]   ;;  %s692_s3 = inlined_call_operand.vmem [shape: bf16[64,64], index: 3, kind: input, shape index: {}]   ;;  %s693_s4 = inlined_call_operand.vmem [shape: f32[64,1], index: 4, kind: input, shape index: {}]   ;;  %s694_s5 = inlined_call_operand.vmem [shape: bf16[8,64], index: 5, kind: input, shape index: {}]   ;;  %s695_s6 = inlined_call_operand.vmem [shape: f32[8,1], index: 6, kind: input, shape index: {}]   ;;  %s696_s7 = inlined_call_operand.hbm [shape: f32[8,128], index: 7, kind: output, shape index: {}]  }
   0x1   :  { %v28_v0 = vld [vmem:[%s689_s0] sm:$0xff]  ;;  %v512_v4 = vld [vmem:[%s690_s1 + $0x8] sm:$0xff]   ;;  %v513_v5 = vld [vmem:[%s690_s1 + $0x10] sm:$0xff]   ;;  %509 = vset.pattern.permute.xlu0 %v543_v6  ;;  %510 = vset.pattern.permute.xlu1 %v543_v6 }
   0x2   :  { %v29_v1 = vpack.c.bf16 %v28_v0, %v28_v0  ;;  %v511_v2 = vld [vmem:[%s690_s1] sm:$0xff]   ;;  %v40_v8 = vld [vmem:[%s691_s2 + $0x10] sm:$0xff]  ;;  %v39_v9 = vld [vmem:[%s691_s2 + $0x8] sm:$0xff] }
   0x3   :  { %468 = vmatprep.mubr.msk.bf16.mxu0 %vm106_vm1, %v511_v2  ;;  %v38_v7 = vld [vmem:[%s691_s2] sm:$0xff]  ;;  %58 = vperm.xlu1 %510, %v40_v8   ;;  %v41_v10 = vld [vmem:[%s691_s2 + $0x18] sm:$0xff]  ;;  %v43_v13 = vld [vmem:[%s691_s2 + $0x28] sm:$0xff] }
   0x4   :  { %504 = vmatprep.subr.msk.bf16.mxu0 %vm119_vm0, %v29_v1  ;;  %v121_v3 = vsel %vm119_vm0, %v29_v1, 0  ;;  %48 = vperm.xlu0 %509, %v38_v7   ;;  %v514_v11 = vld [vmem:[%s690_s1 + $0x18] sm:$0xff]   ;;  %v42_v12 = vld [vmem:[%s691_s2 + $0x20] sm:$0xff] }
   0x5   :  { %467 = vmatpush3.bf16.msra.mxu0 %v121_v3 }
   0x7   :  { %63 = vperm.xlu1 %510, %v41_v10  }
   0x8   :  { %469 = vmatmul.mubr.msk.bf16.vlgmr.msra.gmra.mrb[0].mxu0 %vm106_vm1, %v512_v4  ;;  %53 = vperm.xlu0 %509, %v39_v9  }
   0x9   :  { %472 = vmatprep.mubr.msk.bf16.mxu0 %vm106_vm1, %v513_v5 }
   0xa   :  { %12 = vsyncpa [#allocation3], 0  ;;  %v44_v14 = vld [vmem:[%s691_s2 + $0x30] sm:$0xff]  ;;  %v45_v15 = vld [vmem:[%s691_s2 + $0x38] sm:$0xff]  ;;  %vm276_vm2 = vcmask 523264   ;;  %v544_v1 = vmov 0.0  }
   0xb   :  { %73 = vperm.xlu1 %510, %v43_v13   ;;  %v208_v16 = vld [vmem:[%s693_s4] sm:$0xff]  ;;  %v209_v17 = vld [vmem:[%s693_s4 + $0x8] sm:$0xff]  ;;  %v210_v18 = vld [vmem:[%s693_s4 + $0x10] sm:$0xff]  ;;  %492 = vmatprep.subr.bf16.mxu0 %v544_v1  ;;  %vm545_vm3 = vmmov 0   ;;  %s546_s24 = smov [#allocation2]  }
   0xc   :  { %68 = vperm.xlu0 %509, %v42_v12   ;;  %v211_v19 = vld [vmem:[%s693_s4 + $0x18] sm:$0xff]  ;;  %v212_v20 = vld [vmem:[%s693_s4 + $0x20] sm:$0xff]  ;;  %v213_v21 = vld [vmem:[%s693_s4 + $0x28] sm:$0xff]  ;;  %s423_s25 = sshll.u32 %s546_s24, 4  ;;  %s424_s25 = int_to_ptr.vmem [resolvable:$true] %s423_s25 }
   0xd   :  { %v214_v22 = vld [vmem:[%s693_s4 + $0x30] sm:$0xff]  ;;  %v215_v23 = vld [vmem:[%s693_s4 + $0x38] sm:$0xff]  ;;  %v367_v24 = vld [vmem:[%s695_s6] sm:$0xff]  ;;  %s519_s26 = scalar_lea.vmem %s424_s25, 128  ;;  %p524_p1 = scmp.lt.s32.totalorder %s424_s25, %s424_s25 }
   0xe   :  { %v515_v25 = vld [vmem:[%s692_s3] sm:$0xff]   ;;  %v516_v62 = vld [vmem:[%s692_s3 + $0x8] sm:$0xff]   ;;  %v517_v63 = vld [vmem:[%s692_s3 + $0x10] sm:$0xff]   ;;  %p520_p0 = scmp.ne.s32.totalorder %s424_s25, %s519_s26  ;;  %p525_p2 = scmp.lt.s32.totalorder %s519_s26, %s519_s26 }
   0xf   :  { %83 = vperm.xlu1 %510, %v45_v15   ;;  %484 = vmatprep.mubr.msk.bf16.mxu1 %vm276_vm2, %v515_v25  ;;  %v518_v0 = vld [vmem:[%s692_s3 + $0x18] sm:$0xff]  }
  0x10   :  { %473 = vmatmul.mubr.msk.bf16.gmra.mrb[4].mxu0 %vm106_vm1, %v514_v11  ;;  %78 = vperm.xlu0 %509, %v44_v14   ;;  %p526_p3 = por %p525_p2, %p524_p1 }
  0x11   :  { %500 = vmatprep.mubr.msk.bf16.mxu0 %vm545_vm3, %v544_v1 }
  0x12   :  { %p527_p4 = pnand %p526_p3, %p520_p0 }
  0x13   :  { %223 = vperm.xlu1 %510, %v209_v17  }
  0x14   :  { %218 = vperm.xlu0 %509, %v208_v16  }
  0x17   :  { %233 = vperm.xlu1 %510, %v211_v19  }
  0x18   :  { %228 = vperm.xlu0 %509, %v210_v18  }
  0x1b   :  { %243 = vperm.xlu1 %510, %v213_v21  }
  0x1c   :  { %238 = vperm.xlu0 %509, %v212_v20  }
  0x1f   :  { %253 = vperm.xlu1 %510, %v215_v23  }
  0x20   :  { %248 = vperm.xlu0 %509, %v214_v22  }
  0x24   :  { %370 = vperm.xlu0 %509, %v367_v24  }
  0x82   :  { %v59_v27 = vpop.permute.xlu1 %58 }
  0x83   :  { %v49_v26 = vpop.permute.xlu0 %48 }
  0x86   :  { %v64_v29 = vpop.permute.xlu1 %63 }
  0x87   :  { %v54_v28 = vpop.permute.xlu0 %53 }
  0x8a   :  { %v74_v38 = vpop.permute.xlu1 %73 }
  0x8b   :  { %v69_v33 = vpop.permute.xlu0 %68 }
  0x8e   :  { %v84_v50 = vpop.permute.xlu1 %83 }
  0x8f   :  { %v79_v45 = vpop.permute.xlu0 %78 }
  0x92   :  { %v224_v3 = vpop.permute.xlu1 %223 }
  0x93   :  { %v219_v2 = vpop.permute.xlu0 %218 }
  0x96   :  { %v234_v5 = vpop.permute.xlu1 %233 }
  0x97   :  { %v229_v4 = vpop.permute.xlu0 %228 }
  0x9a   :  { %v244_v14 = vpop.permute.xlu1 %243 }
  0x9b   :  { %v239_v9 = vpop.permute.xlu0 %238 }
  0x9f   :  { %v249_v21 = vpop.permute.xlu0 %248 }
  0xdb   :  { %v470_v30 = vpop.f32.mrb[0].mxu0 }
  0xdc   :  { %v166_v31 = vadd.f32 %v470_v30, %v59_v27  ;;  %v157_v32 = vpop.f32.mrb[1].mxu0 }
  0xdd   :  { %v158_v34 = vadd.f32 %v157_v32, %v49_v26  ;;  %v471_v35 = vpop.f32.mrb[2].mxu0  ;;  %v254_v26 = vpop.permute.xlu1 %253 }
  0xde   :  { %v169_v36 = vadd.f32 %v471_v35, %v64_v29  ;;  %v160_v37 = vpop.f32.mrb[3].mxu0  ;;  %v190_v40 = vmax.f32 %v166_v31, 0.0 }
  0xdf   :  { %v161_v39 = vadd.f32 %v160_v37, %v54_v28  ;;  %v188_v42 = vmax.f32 %v158_v34, 0.0 }
  0xe0   :  { %v191_v41 = vmax.f32 %v169_v36, 0.0 }
  0xe1   :  { %v189_v43 = vmax.f32 %v161_v39, 0.0  ;;  %v371_v39 = vpop.permute.xlu0 %370 }
  0xe2   :  { %v205_v44 = vpack.c.bf16 %v191_v41, %v190_v40 }
  0xe3   :  { %v474_v46 = vpop.f32.mrb[4].mxu0  ;;  %v204_v47 = vpack.c.bf16 %v189_v43, %v188_v42 }
  0xe4   :  { %v182_v48 = vadd.f32 %v474_v46, %v79_v45  ;;  %v173_v49 = vpop.f32.mrb[5].mxu0 }
  0xe5   :  { %v174_v51 = vadd.f32 %v173_v49, %v69_v33  ;;  %v475_v52 = vpop.f32.mrb[6].mxu0  ;;  %476 = vmatprep.subr.bf16.mxu1 %v204_v47 }
  0xe6   :  { %v185_v53 = vadd.f32 %v475_v52, %v84_v50  ;;  %v176_v54 = vpop.f32.mrb[7].mxu0  ;;  %477 = vmatpush3.bf16.msra.mxu1 %v204_v47  ;;  %v194_v56 = vmax.f32 %v182_v48, 0.0 }
  0xe7   :  { %v177_v55 = vadd.f32 %v176_v54, %v74_v38  ;;  %478 = vmatprep.subr.bf16.mxu1 %v205_v44  ;;  %v192_v58 = vmax.f32 %v174_v51, 0.0  ;;  %v362_v38 = vld [vmem:[%s694_s5] sm:$0xf] }
  0xe8   :  { %v195_v57 = vmax.f32 %v185_v53, 0.0 }
  0xe9   :  { %v193_v59 = vmax.f32 %v177_v55, 0.0 }
  0xea   :  { %v207_v60 = vpack.c.bf16 %v195_v57, %v194_v56  ;;  %479 = vmatpush3.bf16.msra.mxu1 %v205_v44 }
  0xeb   :  { %v206_v61 = vpack.c.bf16 %v193_v59, %v192_v58 }
  0xed   :  { %480 = vmatprep.subr.bf16.mxu1 %v206_v61 }
  0xee   :  { %481 = vmatpush3.bf16.msra.mxu1 %v206_v61 }
  0xef   :  { %482 = vmatprep.subr.bf16.mxu1 %v207_v60 }
  0xf2   :  { %483 = vmatpush3.bf16.msra.mxu1 %v207_v60 }
  0xf5   :  { %485 = vmatmul.mubr.msk.bf16.vlgmr.msra.gmra.mrb[0].mxu1 %vm276_vm2, %v516_v62 }
  0xf6   :  { %488 = vmatprep.mubr.msk.bf16.mxu1 %vm276_vm2, %v517_v63 }
  0xfd   :  { %489 = vmatmul.mubr.msk.bf16.gmra.mrb[4].mxu1 %vm276_vm2, %v518_v0 }
 0x1c8   :  { %v486_v6 = vpop.f32.mrb[0].mxu1 }
 0x1c9   :  { %v332_v7 = vadd.f32 %v486_v6, %v229_v4  ;;  %v323_v8 = vpop.f32.mrb[1].mxu1 }
 0x1ca   :  { %v324_v10 = vadd.f32 %v323_v8, %v219_v2  ;;  %v487_v11 = vpop.f32.mrb[2].mxu1 }
 0x1cb   :  { %v335_v12 = vadd.f32 %v487_v11, %v234_v5  ;;  %v326_v13 = vpop.f32.mrb[3].mxu1  ;;  %v356_v16 = vmax.f32 %v332_v7, 0.0 }
 0x1cc   :  { %v327_v15 = vadd.f32 %v326_v13, %v224_v3  ;;  %v354_v18 = vmax.f32 %v324_v10, 0.0 }
 0x1cd   :  { %v357_v17 = vmax.f32 %v335_v12, 0.0 }
 0x1ce   :  { %v355_v19 = vmax.f32 %v327_v15, 0.0 }
 0x1cf   :  { %v364_v20 = vpack.c.bf16 %v357_v17, %v356_v16 }
 0x1d0   :  { %v363_v22 = vpack.c.bf16 %v355_v19, %v354_v18  ;;  %v490_v23 = vpop.f32.mrb[4].mxu1 }
 0x1d1   :  { %v348_v24 = vadd.f32 %v490_v23, %v249_v21  ;;  %v339_v25 = vpop.f32.mrb[5].mxu1 }
 0x1d2   :  { %v340_v27 = vadd.f32 %v339_v25, %v239_v9  ;;  %v491_v28 = vpop.f32.mrb[6].mxu1  ;;  %493 = vmatpush3.bf16.msra.mxu0 %v363_v22 }
 0x1d3   :  { %v351_v29 = vadd.f32 %v491_v28, %v254_v26  ;;  %v342_v30 = vpop.f32.mrb[7].mxu1  ;;  %494 = vmatprep.subr.bf16.mxu0 %v544_v1  ;;  %v360_v32 = vmax.f32 %v348_v24, 0.0 }
 0x1d4   :  { %v343_v31 = vadd.f32 %v342_v30, %v244_v14  ;;  %v358_v34 = vmax.f32 %v340_v27, 0.0 }
 0x1d5   :  { %v361_v33 = vmax.f32 %v351_v29, 0.0 }
 0x1d6   :  { %v359_v35 = vmax.f32 %v343_v31, 0.0  ;;  %495 = vmatpush3.bf16.msra.mxu0 %v364_v20 }
 0x1d7   :  { %v366_v36 = vpack.c.bf16 %v361_v33, %v360_v32  ;;  %496 = vmatprep.subr.bf16.mxu0 %v544_v1 }
 0x1d8   :  { %v365_v37 = vpack.c.bf16 %v359_v35, %v358_v34 }
 0x1da   :  { %497 = vmatpush3.bf16.msra.mxu0 %v365_v37 }
 0x1db   :  { %498 = vmatprep.subr.bf16.mxu0 %v544_v1 }
 0x1de   :  { %499 = vmatpush3.bf16.msra.mxu0 %v366_v36 }
 0x1e1   :  { %501 = vmatmul.mubr.msk.bf16.vlgmr.msra.gmra.mrb[8].mxu0 %vm276_vm2, %v362_v38 }
 0x2b4   :  { %v410_v40 = vpop.f32.mrb[8].mxu0 }
 0x2b5   :  { %v411_v41 = vadd.f32 %v410_v40, %v371_v39  ;;  %v502_v42 = vpop.f32.mrb[9].mxu0 }
 0x2b6   :  { %v413_v43 = vpop.f32.mrb[10].mxu0 }
 0x2b7   :  { %416 = vst [vmem:[#allocation2] sm:$0xff] %v411_v41  ;;  %v503_v44 = vpop.f32.mrb[11].mxu0 }
 0x2b8   :  { %530 = shalt.err (!%p527_p4)
}
 0x2b9   :  { %s531_s28 = scalar_lea.hbm %s696_s7, 128 }
 0x2ba   :  { %p532_p5 = scmp.ne.s32.totalorder %s696_s7, %s531_s28  ;;  %p535_p6 = scmp.lt.u32.totalorder %s531_s28, %s696_s7 }
 0x2bc   :  { %p537_p7 = pnand %p535_p6, %p532_p5 }
 0x2be   :  { %540 = shalt.err (!%p537_p7)
}
 0x2bf   :  { %426 = dma.vmem_to_hbm [thread:$0]  %s424_s25, 128, %s696_s7, [#allocation3]  }
 0x2c0   :  { %541 = dma.done.wait [#allocation3], 128  }
 0x2c1   :  { %542 = vsyncadd [#allocation3], 4294967168 }
 0x2c2   :  { %430 = vsyncpa [#allocation3], 1 }

</bundles_post_ra>
